<compile_context>
chip_gen: v7x
topology: tpu7x:2x2x1
jax: 0.10.0
libtpu: 0.0.40
codegen_flags: <defaults>
</compile_context>

<pallas_src>
import functools

import jax
import jax.numpy as jnp
from jax import lax
from jax.experimental import pallas as pl


# ----------------------------------------------------------------------------
# Config (plays the role of the PyTorch `config` dict)
# ----------------------------------------------------------------------------
CONFIG = dict(
    vocab_size=32,
    emb_dim=16,
    hid_size=32,
    num_layers=2,
    attn=True,
    attn_model="dot",
)


# ----------------------------------------------------------------------------
# Fused decoder kernel
# ----------------------------------------------------------------------------
def _decoder_kernel(ids_ref, h0_ref, emb_ref, gru_ref, out_ref,
                    logp_ref, hn_ref, *, dims):
    """one-hot embed -> ReLU -> NL x GRU -> Linear -> LogSoftmax, all in VMEM.

    Packed operands (see pack_params):
      ids_ref : (B*T, 1) int32   row l*T + t  ==  input_data[t, l]
      h0_ref  : (NL, T, H)       initial hidden state
      emb_ref : (V, H)           embedding table, cols E:H zero-padded
      gru_ref : (NL, 2H+2, 3H)   rows 0:H  = W_ih^T (zero-padded to H rows)
                                 rows H:2H = W_hh^T
                                 row 2H    = b_ih + [b_hh_r | b_hh_z | 0]
                                 row 2H+1  = b_hh (only the n slice is used)
      out_ref : (H+1, V)         rows 0:H = out_W^T, row H = out_b
    Outputs:
      logp_ref: (B*T, V)         lane/sublane-dense log-probs
      hn_ref  : (NL, T, H)       final hidden (HBM-aliased onto h0)
    """
    T, B, E, H, V, NL = dims
    BT = B * T
    f32 = jnp.float32

    # ---- Embedding as one-hot @ table on the MXU, ReLU applied once. -------
    ids = ids_ref[...]                                              # (BT, 1)
    iota = lax.broadcasted_iota(jnp.int32, (BT, V), 1)
    onehot = (ids == iota).astype(f32)                              # (BT, V)
    x_all = jnp.maximum(
        jnp.dot(onehot, emb_ref[...], preferred_element_type=f32), 0.0)

    # ---- GRU layers (NL layers x B recurrent steps, unrolled at trace time).
    for layer in range(NL):
        blk = gru_ref[layer]                                        # (2H+2, 3H)
        w_ih = blk[0:H, :]                                          # (H, 3H)
        w_hh = blk[H:2 * H, :]                                      # (H, 3H)
        b_fused = blk[2 * H:2 * H + 1, :]                           # (1, 3H)
        # Only the n-gate part of b_hh survives inside the recurrence; its
        # broadcast is hoisted out of the serial loop.
        b_hh_n = jnp.broadcast_to(blk[2 * H + 1:2 * H + 2, 2 * H:3 * H], (T, H))

        # Batched input projection: one matmul for all B steps, off the
        # latency-critical recurrence chain.
        gi_all = jnp.dot(x_all, w_ih, preferred_element_type=f32) + b_fused

        h = h0_ref[layer]                                           # (T, H)
        outs = []
        for l in range(B):
            gi = gi_all[l * T:(l + 1) * T, :]                       # (T, 3H)
            gh = jnp.dot(h, w_hh, preferred_element_type=f32)       # (T, 3H)
            # One sigmoid over the fused r|z region (single EUP push).
            rz = jax.nn.sigmoid(gi[:, :2 * H] + gh[:, :2 * H])
            r = rz[:, :H]
            z = rz[:, H:2 * H]
            n = jnp.tanh(gi[:, 2 * H:] + r * (gh[:, 2 * H:] + b_hh_n))
            h = (1.0 - z) * n + z * h
            outs.append(h)
        hn_ref[layer] = h                                           # one dense write
        x_all = jnp.concatenate(outs, axis=0)                       # (BT, H)

    # ---- Output projection + LogSoftmax: one matmul, one reduce, one store.
    ob = out_ref[...]                                               # (H+1, V)
    logits = jnp.dot(x_all, ob[0:H, :], preferred_element_type=f32) + ob[H:H + 1, :]
    m = jnp.max(logits, axis=-1, keepdims=True)
    lse = jnp.log(jnp.sum(jnp.exp(logits - m), axis=-1, keepdims=True)) + m
    logp_ref[...] = logits - lse                                    # (BT, V) dense


# ----------------------------------------------------------------------------
# Decoder forward (thin glue around one pallas_call)
# ----------------------------------------------------------------------------
def decoder_forward(packed, input_data, hidden, encoder_outputs=None,
                    config=CONFIG):
    """Mirrors Decoder.forward.  Returns (log_probs (T,B,V), hidden (NL,T,H)).

    The PyTorch forward's attention branch computes `concat_output` and then
    discards it (it never affects the returned tensors), so it is omitted;
    `encoder_outputs` is accepted only for signature parity.
    """
    T, B = input_data.shape
    E, H = config["emb_dim"], config["hid_size"]
    V, NL = config["vocab_size"], config["num_layers"]
    BT = B * T

    # GRU step index l (original dim 1) becomes the slow axis of the flat ids.
    ids = input_data.astype(jnp.int32).T.reshape(BT, 1)

    flops = 2 * BT * V * H + 2 * BT * H * V                  # embed + out proj
    for _ in range(NL):
        flops += 2 * BT * H * 3 * H + 2 * B * T * H * 3 * H  # gi + recurrent gh
    transcendentals = NL * B * (2 * T * H + T * H) + BT * V + BT
    bytes_accessed = 4 * (BT + 2 * NL * T * H + V * H
                          + NL * (2 * H + 2) * 3 * H + (H + 1) * V + BT * V)

    kernel = functools.partial(_decoder_kernel, dims=(T, B, E, H, V, NL))
    logp_flat, hidden_out = pl.pallas_call(
        kernel,
        out_shape=(jax.ShapeDtypeStruct((BT, V), jnp.float32),
                   jax.ShapeDtypeStruct((NL, T, H), jnp.float32)),
        # hidden (input 1) aliases hn (output 1): in an outer decode loop the
        # state does not round-trip through a fresh HBM buffer every token.
        input_output_aliases={1: 1},
        cost_estimate=pl.CostEstimate(flops=flops,
                                      transcendentals=transcendentals,
                                      bytes_accessed=bytes_accessed),
    )(ids, hidden, packed["emb"], packed["gru"], packed["out"])

    # Kernel stores a lane/sublane-dense (B*T, V) slab; produce the
    # module-facing (T, B, V) layout with cheap XLA glue here.
    log_probs = logp_flat.reshape(B, T, V).transpose(1, 0, 2)
    return log_probs, hidden_out


# ----------------------------------------------------------------------------
# Pure-JAX reference (PyTorch math, HIGHEST-precision matmuls)
# ----------------------------------------------------------------------------
def decoder_forward_ref(params, input_data, hidden, config=CONFIG):
    T, B = input_data.shape
    H, NL = config["hid_size"], config["num_layers"]
    hi = lax.Precision.HIGHEST
    layer_in = jnp.maximum(params["embedding"][input_data], 0.0)    # (T, B, E)
    finals = []
    for layer in range(NL):
        p = params["gru"][layer]
        w_ih_t, w_hh_t = p["w_ih"].T, p["w_hh"].T
        h = hidden[layer]
        outs = []
        for l in range(B):
            gi = jnp.dot(layer_in[:, l, :], w_ih_t, precision=hi) + p["b_ih"]
            gh = jnp.dot(h, w_hh_t, precision=hi) + p["b_hh"]
            r = jax.nn.sigmoid(gi[:, 0:H] + gh[:, 0:H])
            z = jax.nn.sigmoid(gi[:, H:2 * H] + gh[:, H:2 * H])
            n = jnp.tanh(gi[:, 2 * H:] + r * gh[:, 2 * H:])
            h = (1.0 - z) * n + z * h
            outs.append(h)
        layer_in = jnp.stack(outs, axis=1)                          # (T, B, H)
        finals.append(h)
    logits = jnp.dot(layer_in, params["out_w"].T, precision=hi) + params["out_b"]
    return jax.nn.log_softmax(logits, axis=2), jnp.stack(finals, axis=0)


# ----------------------------------------------------------------------------
# Deterministic PyTorch-layout parameters + pre-packed kernel operands
# ----------------------------------------------------------------------------
def init_params(config, key):
    V, E, H, NL = (config["vocab_size"], config["emb_dim"],
                   config["hid_size"], config["num_layers"])
    keys = iter(jax.random.split(key, 3 + 4 * NL))
    nrm = lambda shape, s=0.1: s * jax.random.normal(next(keys), shape, jnp.float32)

    params = {"embedding": nrm((V, E))}                   # stands in for glove_emb
    gru = []
    for layer in range(NL):
        in_dim = E if layer == 0 else H
        gru.append(dict(w_ih=nrm((3 * H, in_dim)),        # weight_ih_l{k} (r|z|n)
                        w_hh=nrm((3 * H, H)),             # weight_hh_l{k}
                        b_ih=nrm((3 * H,)),
                        b_hh=nrm((3 * H,))))
    params["gru"] = gru
    params["out_w"] = nrm((V, H))                         # nn.Linear(H, V) weight
    params["out_b"] = nrm((V,))
    return params


def pack_params(params, config):
    """Pack all decoder weights into 3 dense kernel operands (one DMA each)."""
    V, E, H, NL = (config["vocab_size"], config["emb_dim"],
                   config["hid_size"], config["num_layers"])
    assert E <= H, "layer-0 input dim is zero-padded up to H"

    # Embedding table padded to H columns so layer-0 sees a (BT, H) input.
    emb = jnp.zeros((V, H), jnp.float32).at[:, :E].set(params["embedding"])

    blocks = []
    for layer in range(NL):
        p = params["gru"][layer]
        in_dim = p["w_ih"].shape[1]
        w_ih_t = jnp.zeros((H, 3 * H), jnp.float32).at[:in_dim, :].set(p["w_ih"].T)
        w_hh_t = p["w_hh"].T
        # Fold b_hh's r|z components into b_ih; only the n slice of b_hh must
        # stay inside the recurrence (it sits inside r * (...)).
        b_fused = p["b_ih"] + jnp.concatenate(
            [p["b_hh"][:2 * H], jnp.zeros((H,), jnp.float32)])
        blocks.append(jnp.concatenate(
            [w_ih_t, w_hh_t, b_fused[None, :], p["b_hh"][None, :]], axis=0))
    gru = jnp.stack(blocks, axis=0)                       # (NL, 2H+2, 3H)

    out = jnp.concatenate([params["out_w"].T, params["out_b"][None, :]],
                          axis=0)                         # (H+1, V)
    return dict(emb=emb, gru=gru, out=out)


# ----------------------------------------------------------------------------
if __name__ == "__main__":
    cfg = CONFIG
    T, B = 8, 2                                           # input_data: (T, B)
    H, V, NL = cfg["hid_size"], cfg["vocab_size"], cfg["num_layers"]

    key = jax.random.PRNGKey(0)
    k_par, k_inp, k_hid, k_enc = jax.random.split(key, 4)

    params = init_params(cfg, k_par)
    packed = pack_params(params, cfg)
    input_data = jax.random.randint(k_inp, (T, B), 0, V, dtype=jnp.int32)
    hidden = 0.1 * jax.random.normal(k_hid, (NL, T, H), jnp.float32)
    # encoder_outputs kept for signature parity (dead w.r.t. the outputs).
    encoder_outputs = 0.1 * jax.random.normal(k_enc, (T, T, H), jnp.float32)

    fwd = jax.jit(functools.partial(decoder_forward, config=cfg))
    log_probs, hidden_out = fwd(packed, input_data, hidden, encoder_outputs)
    jax.block_until_ready((log_probs, hidden_out))

    assert log_probs.shape == (T, B, V)
    assert hidden_out.shape == (NL, T, H)
    # LogSoftmax rows must (log-)sum to ~1.
    assert bool(jnp.allclose(jnp.sum(jnp.exp(log_probs), axis=2), 1.0, atol=1e-4))
    # Tight check against the HIGHEST-precision pure-JAX reference.
    ref_logp, ref_hidden = decoder_forward_ref(params, input_data, hidden, cfg)
    assert bool(jnp.allclose(log_probs, ref_logp, atol=1e-5))
    assert bool(jnp.allclose(hidden_out, ref_hidden, atol=1e-5))
    print("KERNEL_OK")
</pallas_src>

<mosaic_0001>
module attributes {stable_mosaic.version = 11 : i64} {
  func.func @_decoder_kernel(%arg0: memref<16x1xi32, #tpu.memory_space<vmem>>, %arg1: memref<2x8x32xf32, #tpu.memory_space<vmem>>, %arg2: memref<32x32xf32, #tpu.memory_space<vmem>>, %arg3: memref<2x66x96xf32, #tpu.memory_space<vmem>>, %arg4: memref<33x32xf32, #tpu.memory_space<vmem>>, %arg5: memref<16x32xf32, #tpu.memory_space<vmem>>, %arg6: memref<2x8x32xf32, #tpu.memory_space<vmem>>) attributes {dimension_semantics = [], scalar_prefetch = 0 : i64, scratch_operands = 0 : i64, tpu.core_type = #tpu.core_type<tc>} {
    %c0 = arith.constant 0 : index
    %c0_0 = arith.constant 0 : index
    %0 = vector.load %arg0[%c0, %c0_0] : memref<16x1xi32, #tpu.memory_space<vmem>>, vector<16x1xi32>
    %1 = tpu.iota {dimensions = array<i32: 1>} : vector<16x32xi32>
    %2 = vector.broadcast %0 : vector<16x1xi32> to vector<16x32xi32>
    %3 = arith.cmpi eq, %2, %1 : vector<16x32xi32>
    %4 = arith.extui %3 : vector<16x32xi1> to vector<16x32xi32>
    %5 = arith.sitofp %4 : vector<16x32xi32> to vector<16x32xf32>
    %c0_1 = arith.constant 0 : index
    %c0_2 = arith.constant 0 : index
    %6 = vector.load %arg2[%c0_1, %c0_2] : memref<32x32xf32, #tpu.memory_space<vmem>>, vector<32x32xf32>
    %cst = arith.constant dense<0.000000e+00> : vector<16x32xf32>
    %7 = tpu.matmul %5, %6, %cst {dimension_numbers = #tpu.dot_dimension_numbers<[1], [0], [0], [1], [0, 0, 1, 1], [], []>} : vector<16x32xf32>, vector<32x32xf32>, vector<16x32xf32> -> vector<16x32xf32>
    %cst_3 = arith.constant 0.000000e+00 : f32
    %8 = vector.broadcast %cst_3 : f32 to vector<16x32xf32>
    %9 = arith.maximumf %7, %8 : vector<16x32xf32>
    %c0_4 = arith.constant 0 : index
    %c0_5 = arith.constant 0 : index
    %c0_6 = arith.constant 0 : index
    %10 = vector.load %arg3[%c0_4, %c0_5, %c0_6] : memref<2x66x96xf32, #tpu.memory_space<vmem>>, vector<1x66x96xf32>
    %11 = vector.shape_cast %10 : vector<1x66x96xf32> to vector<66x96xf32>
    %12 = vector.extract_strided_slice %11 {offsets = [0, 0], sizes = [32, 96], strides = [1, 1]} : vector<66x96xf32> to vector<32x96xf32>
    %13 = vector.extract_strided_slice %11 {offsets = [32, 0], sizes = [32, 96], strides = [1, 1]} : vector<66x96xf32> to vector<32x96xf32>
    %14 = vector.extract_strided_slice %11 {offsets = [64, 0], sizes = [1, 96], strides = [1, 1]} : vector<66x96xf32> to vector<1x96xf32>
    %15 = vector.extract_strided_slice %11 {offsets = [65, 64], sizes = [1, 32], strides = [1, 1]} : vector<66x96xf32> to vector<1x32xf32>
    %16 = vector.shape_cast %15 : vector<1x32xf32> to vector<1x32xf32>
    %17 = vector.broadcast %16 : vector<1x32xf32> to vector<8x32xf32>
    %cst_7 = arith.constant dense<0.000000e+00> : vector<16x96xf32>
    %18 = tpu.matmul %9, %12, %cst_7 {dimension_numbers = #tpu.dot_dimension_numbers<[1], [0], [0], [1], [0, 0, 1, 1], [], []>} : vector<16x32xf32>, vector<32x96xf32>, vector<16x96xf32> -> vector<16x96xf32>
    %19 = vector.broadcast %14 : vector<1x96xf32> to vector<16x96xf32>
    %20 = arith.addf %18, %19 : vector<16x96xf32>
    %c0_8 = arith.constant 0 : index
    %c0_9 = arith.constant 0 : index
    %c0_10 = arith.constant 0 : index
    %21 = vector.load %arg1[%c0_8, %c0_9, %c0_10] : memref<2x8x32xf32, #tpu.memory_space<vmem>>, vector<1x8x32xf32>
    %22 = vector.shape_cast %21 : vector<1x8x32xf32> to vector<8x32xf32>
    %23 = vector.extract_strided_slice %20 {offsets = [0, 0], sizes = [8, 96], strides = [1, 1]} : vector<16x96xf32> to vector<8x96xf32>
    %cst_11 = arith.constant dense<0.000000e+00> : vector<8x96xf32>
    %24 = tpu.matmul %22, %13, %cst_11 {dimension_numbers = #tpu.dot_dimension_numbers<[1], [0], [0], [1], [0, 0, 1, 1], [], []>} : vector<8x32xf32>, vector<32x96xf32>, vector<8x96xf32> -> vector<8x96xf32>
    %25 = vector.extract_strided_slice %23 {offsets = [0, 0], sizes = [8, 64], strides = [1, 1]} : vector<8x96xf32> to vector<8x64xf32>
    %26 = vector.extract_strided_slice %24 {offsets = [0, 0], sizes = [8, 64], strides = [1, 1]} : vector<8x96xf32> to vector<8x64xf32>
    %27 = arith.addf %25, %26 : vector<8x64xf32>
    %28 = arith.negf %27 : vector<8x64xf32>
    %29 = math.exp %28 : vector<8x64xf32>
    %cst_12 = arith.constant 1.000000e+00 : f32
    %30 = vector.broadcast %cst_12 : f32 to vector<8x64xf32>
    %31 = arith.addf %30, %29 : vector<8x64xf32>
    %32 = arith.divf %30, %31 : vector<8x64xf32>
    %33 = vector.extract_strided_slice %32 {offsets = [0, 0], sizes = [8, 32], strides = [1, 1]} : vector<8x64xf32> to vector<8x32xf32>
    %34 = vector.extract_strided_slice %32 {offsets = [0, 32], sizes = [8, 32], strides = [1, 1]} : vector<8x64xf32> to vector<8x32xf32>
    %35 = vector.extract_strided_slice %23 {offsets = [0, 64], sizes = [8, 32], strides = [1, 1]} : vector<8x96xf32> to vector<8x32xf32>
    %36 = vector.extract_strided_slice %24 {offsets = [0, 64], sizes = [8, 32], strides = [1, 1]} : vector<8x96xf32> to vector<8x32xf32>
    %37 = arith.addf %36, %17 : vector<8x32xf32>
    %38 = arith.mulf %33, %37 : vector<8x32xf32>
    %39 = arith.addf %35, %38 : vector<8x32xf32>
    %40 = math.tanh %39 : vector<8x32xf32>
    %cst_13 = arith.constant 1.000000e+00 : f32
    %41 = vector.broadcast %cst_13 : f32 to vector<8x32xf32>
    %42 = arith.subf %41, %34 : vector<8x32xf32>
    %43 = arith.mulf %42, %40 : vector<8x32xf32>
    %44 = arith.mulf %34, %22 : vector<8x32xf32>
    %45 = arith.addf %43, %44 : vector<8x32xf32>
    %46 = vector.extract_strided_slice %20 {offsets = [8, 0], sizes = [8, 96], strides = [1, 1]} : vector<16x96xf32> to vector<8x96xf32>
    %cst_14 = arith.constant dense<0.000000e+00> : vector<8x96xf32>
    %47 = tpu.matmul %45, %13, %cst_14 {dimension_numbers = #tpu.dot_dimension_numbers<[1], [0], [0], [1], [0, 0, 1, 1], [], []>} : vector<8x32xf32>, vector<32x96xf32>, vector<8x96xf32> -> vector<8x96xf32>
    %48 = vector.extract_strided_slice %46 {offsets = [0, 0], sizes = [8, 64], strides = [1, 1]} : vector<8x96xf32> to vector<8x64xf32>
    %49 = vector.extract_strided_slice %47 {offsets = [0, 0], sizes = [8, 64], strides = [1, 1]} : vector<8x96xf32> to vector<8x64xf32>
    %50 = arith.addf %48, %49 : vector<8x64xf32>
    %51 = arith.negf %50 : vector<8x64xf32>
    %52 = math.exp %51 : vector<8x64xf32>
    %cst_15 = arith.constant 1.000000e+00 : f32
    %53 = vector.broadcast %cst_15 : f32 to vector<8x64xf32>
    %54 = arith.addf %53, %52 : vector<8x64xf32>
    %55 = arith.divf %53, %54 : vector<8x64xf32>
    %56 = vector.extract_strided_slice %55 {offsets = [0, 0], sizes = [8, 32], strides = [1, 1]} : vector<8x64xf32> to vector<8x32xf32>
    %57 = vector.extract_strided_slice %55 {offsets = [0, 32], sizes = [8, 32], strides = [1, 1]} : vector<8x64xf32> to vector<8x32xf32>
    %58 = vector.extract_strided_slice %46 {offsets = [0, 64], sizes = [8, 32], strides = [1, 1]} : vector<8x96xf32> to vector<8x32xf32>
    %59 = vector.extract_strided_slice %47 {offsets = [0, 64], sizes = [8, 32], strides = [1, 1]} : vector<8x96xf32> to vector<8x32xf32>
    %60 = arith.addf %59, %17 : vector<8x32xf32>
    %61 = arith.mulf %56, %60 : vector<8x32xf32>
    %62 = arith.addf %58, %61 : vector<8x32xf32>
    %63 = math.tanh %62 : vector<8x32xf32>
    %cst_16 = arith.constant 1.000000e+00 : f32
    %64 = vector.broadcast %cst_16 : f32 to vector<8x32xf32>
    %65 = arith.subf %64, %57 : vector<8x32xf32>
    %66 = arith.mulf %65, %63 : vector<8x32xf32>
    %67 = arith.mulf %57, %45 : vector<8x32xf32>
    %68 = arith.addf %66, %67 : vector<8x32xf32>
    %c0_17 = arith.constant 0 : index
    %c0_18 = arith.constant 0 : index
    %c0_19 = arith.constant 0 : index
    %69 = vector.load %arg6[%c0_17, %c0_18, %c0_19] : memref<2x8x32xf32, #tpu.memory_space<vmem>>, vector<1x8x32xf32>
    %70 = vector.shape_cast %69 : vector<1x8x32xf32> to vector<8x32xf32>
    %71 = vector.shape_cast %68 : vector<8x32xf32> to vector<1x8x32xf32>
    tpu.vector_store %arg6[%c0_17, %c0_18, %c0_19], %71 {strides = array<i32>} : memref<2x8x32xf32, #tpu.memory_space<vmem>>, vector<1x8x32xf32>,
    %72 = tpu.concatenate %45, %68 in 0 : vector<8x32xf32>, vector<8x32xf32> -> vector<16x32xf32>
    %c1 = arith.constant 1 : index
    %c0_20 = arith.constant 0 : index
    %c0_21 = arith.constant 0 : index
    %73 = vector.load %arg3[%c1, %c0_20, %c0_21] : memref<2x66x96xf32, #tpu.memory_space<vmem>>, vector<1x66x96xf32>
    %74 = vector.shape_cast %73 : vector<1x66x96xf32> to vector<66x96xf32>
    %75 = vector.extract_strided_slice %74 {offsets = [0, 0], sizes = [32, 96], strides = [1, 1]} : vector<66x96xf32> to vector<32x96xf32>
    %76 = vector.extract_strided_slice %74 {offsets = [32, 0], sizes = [32, 96], strides = [1, 1]} : vector<66x96xf32> to vector<32x96xf32>
    %77 = vector.extract_strided_slice %74 {offsets = [64, 0], sizes = [1, 96], strides = [1, 1]} : vector<66x96xf32> to vector<1x96xf32>
    %78 = vector.extract_strided_slice %74 {offsets = [65, 64], sizes = [1, 32], strides = [1, 1]} : vector<66x96xf32> to vector<1x32xf32>
    %79 = vector.shape_cast %78 : vector<1x32xf32> to vector<1x32xf32>
    %80 = vector.broadcast %79 : vector<1x32xf32> to vector<8x32xf32>
    %cst_22 = arith.constant dense<0.000000e+00> : vector<16x96xf32>
    %81 = tpu.matmul %72, %75, %cst_22 {dimension_numbers = #tpu.dot_dimension_numbers<[1], [0], [0], [1], [0, 0, 1, 1], [], []>} : vector<16x32xf32>, vector<32x96xf32>, vector<16x96xf32> -> vector<16x96xf32>
    %82 = vector.broadcast %77 : vector<1x96xf32> to vector<16x96xf32>
    %83 = arith.addf %81, %82 : vector<16x96xf32>
    %c1_23 = arith.constant 1 : index
    %c0_24 = arith.constant 0 : index
    %c0_25 = arith.constant 0 : index
    %84 = vector.load %arg1[%c1_23, %c0_24, %c0_25] : memref<2x8x32xf32, #tpu.memory_space<vmem>>, vector<1x8x32xf32>
    %85 = vector.shape_cast %84 : vector<1x8x32xf32> to vector<8x32xf32>
    %86 = vector.extract_strided_slice %83 {offsets = [0, 0], sizes = [8, 96], strides = [1, 1]} : vector<16x96xf32> to vector<8x96xf32>
    %cst_26 = arith.constant dense<0.000000e+00> : vector<8x96xf32>
    %87 = tpu.matmul %85, %76, %cst_26 {dimension_numbers = #tpu.dot_dimension_numbers<[1], [0], [0], [1], [0, 0, 1, 1], [], []>} : vector<8x32xf32>, vector<32x96xf32>, vector<8x96xf32> -> vector<8x96xf32>
    %88 = vector.extract_strided_slice %86 {offsets = [0, 0], sizes = [8, 64], strides = [1, 1]} : vector<8x96xf32> to vector<8x64xf32>
    %89 = vector.extract_strided_slice %87 {offsets = [0, 0], sizes = [8, 64], strides = [1, 1]} : vector<8x96xf32> to vector<8x64xf32>
    %90 = arith.addf %88, %89 : vector<8x64xf32>
    %91 = arith.negf %90 : vector<8x64xf32>
    %92 = math.exp %91 : vector<8x64xf32>
    %cst_27 = arith.constant 1.000000e+00 : f32
    %93 = vector.broadcast %cst_27 : f32 to vector<8x64xf32>
    %94 = arith.addf %93, %92 : vector<8x64xf32>
    %95 = arith.divf %93, %94 : vector<8x64xf32>
    %96 = vector.extract_strided_slice %95 {offsets = [0, 0], sizes = [8, 32], strides = [1, 1]} : vector<8x64xf32> to vector<8x32xf32>
    %97 = vector.extract_strided_slice %95 {offsets = [0, 32], sizes = [8, 32], strides = [1, 1]} : vector<8x64xf32> to vector<8x32xf32>
    %98 = vector.extract_strided_slice %86 {offsets = [0, 64], sizes = [8, 32], strides = [1, 1]} : vector<8x96xf32> to vector<8x32xf32>
    %99 = vector.extract_strided_slice %87 {offsets = [0, 64], sizes = [8, 32], strides = [1, 1]} : vector<8x96xf32> to vector<8x32xf32>
    %100 = arith.addf %99, %80 : vector<8x32xf32>
    %101 = arith.mulf %96, %100 : vector<8x32xf32>
    %102 = arith.addf %98, %101 : vector<8x32xf32>
    %103 = math.tanh %102 : vector<8x32xf32>
    %cst_28 = arith.constant 1.000000e+00 : f32
    %104 = vector.broadcast %cst_28 : f32 to vector<8x32xf32>
    %105 = arith.subf %104, %97 : vector<8x32xf32>
    %106 = arith.mulf %105, %103 : vector<8x32xf32>
    %107 = arith.mulf %97, %85 : vector<8x32xf32>
    %108 = arith.addf %106, %107 : vector<8x32xf32>
    %109 = vector.extract_strided_slice %83 {offsets = [8, 0], sizes = [8, 96], strides = [1, 1]} : vector<16x96xf32> to vector<8x96xf32>
    %cst_29 = arith.constant dense<0.000000e+00> : vector<8x96xf32>
    %110 = tpu.matmul %108, %76, %cst_29 {dimension_numbers = #tpu.dot_dimension_numbers<[1], [0], [0], [1], [0, 0, 1, 1], [], []>} : vector<8x32xf32>, vector<32x96xf32>, vector<8x96xf32> -> vector<8x96xf32>
    %111 = vector.extract_strided_slice %109 {offsets = [0, 0], sizes = [8, 64], strides = [1, 1]} : vector<8x96xf32> to vector<8x64xf32>
    %112 = vector.extract_strided_slice %110 {offsets = [0, 0], sizes = [8, 64], strides = [1, 1]} : vector<8x96xf32> to vector<8x64xf32>
    %113 = arith.addf %111, %112 : vector<8x64xf32>
    %114 = arith.negf %113 : vector<8x64xf32>
    %115 = math.exp %114 : vector<8x64xf32>
    %cst_30 = arith.constant 1.000000e+00 : f32
    %116 = vector.broadcast %cst_30 : f32 to vector<8x64xf32>
    %117 = arith.addf %116, %115 : vector<8x64xf32>
    %118 = arith.divf %116, %117 : vector<8x64xf32>
    %119 = vector.extract_strided_slice %118 {offsets = [0, 0], sizes = [8, 32], strides = [1, 1]} : vector<8x64xf32> to vector<8x32xf32>
    %120 = vector.extract_strided_slice %118 {offsets = [0, 32], sizes = [8, 32], strides = [1, 1]} : vector<8x64xf32> to vector<8x32xf32>
    %121 = vector.extract_strided_slice %109 {offsets = [0, 64], sizes = [8, 32], strides = [1, 1]} : vector<8x96xf32> to vector<8x32xf32>
    %122 = vector.extract_strided_slice %110 {offsets = [0, 64], sizes = [8, 32], strides = [1, 1]} : vector<8x96xf32> to vector<8x32xf32>
    %123 = arith.addf %122, %80 : vector<8x32xf32>
    %124 = arith.mulf %119, %123 : vector<8x32xf32>
    %125 = arith.addf %121, %124 : vector<8x32xf32>
    %126 = math.tanh %125 : vector<8x32xf32>
    %cst_31 = arith.constant 1.000000e+00 : f32
    %127 = vector.broadcast %cst_31 : f32 to vector<8x32xf32>
    %128 = arith.subf %127, %120 : vector<8x32xf32>
    %129 = arith.mulf %128, %126 : vector<8x32xf32>
    %130 = arith.mulf %120, %108 : vector<8x32xf32>
    %131 = arith.addf %129, %130 : vector<8x32xf32>
    %c1_32 = arith.constant 1 : index
    %c0_33 = arith.constant 0 : index
    %c0_34 = arith.constant 0 : index
    %132 = vector.load %arg6[%c1_32, %c0_33, %c0_34] : memref<2x8x32xf32, #tpu.memory_space<vmem>>, vector<1x8x32xf32>
    %133 = vector.shape_cast %132 : vector<1x8x32xf32> to vector<8x32xf32>
    %134 = vector.shape_cast %131 : vector<8x32xf32> to vector<1x8x32xf32>
    tpu.vector_store %arg6[%c1_32, %c0_33, %c0_34], %134 {strides = array<i32>} : memref<2x8x32xf32, #tpu.memory_space<vmem>>, vector<1x8x32xf32>,
    %135 = tpu.concatenate %108, %131 in 0 : vector<8x32xf32>, vector<8x32xf32> -> vector<16x32xf32>
    %c0_35 = arith.constant 0 : index
    %c0_36 = arith.constant 0 : index
    %136 = vector.load %arg4[%c0_35, %c0_36] : memref<33x32xf32, #tpu.memory_space<vmem>>, vector<33x32xf32>
    %137 = vector.extract_strided_slice %136 {offsets = [0, 0], sizes = [32, 32], strides = [1, 1]} : vector<33x32xf32> to vector<32x32xf32>
    %cst_37 = arith.constant dense<0.000000e+00> : vector<16x32xf32>
    %138 = tpu.matmul %135, %137, %cst_37 {dimension_numbers = #tpu.dot_dimension_numbers<[1], [0], [0], [1], [0, 0, 1, 1], [], []>} : vector<16x32xf32>, vector<32x32xf32>, vector<16x32xf32> -> vector<16x32xf32>
    %139 = vector.extract_strided_slice %136 {offsets = [32, 0], sizes = [1, 32], strides = [1, 1]} : vector<33x32xf32> to vector<1x32xf32>
    %140 = vector.broadcast %139 : vector<1x32xf32> to vector<16x32xf32>
    %141 = arith.addf %138, %140 : vector<16x32xf32>
    %cst_38 = arith.constant dense<0xFF800000> : vector<16xf32>
    %142 = vector.multi_reduction <maximumf>, %141, %cst_38 [1] : vector<16x32xf32> to vector<16xf32>
    %143 = vector.shape_cast %142 : vector<16xf32> to vector<16x1xf32>
    %144 = vector.broadcast %143 : vector<16x1xf32> to vector<16x32xf32>
    %145 = arith.subf %141, %144 : vector<16x32xf32>
    %146 = math.exp %145 : vector<16x32xf32>
    %cst_39 = arith.constant dense<0.000000e+00> : vector<16xf32>
    %147 = vector.multi_reduction <add>, %146, %cst_39 [1] : vector<16x32xf32> to vector<16xf32>
    %148 = vector.shape_cast %147 : vector<16xf32> to vector<16x1xf32>
    %149 = math.log %148 : vector<16x1xf32>
    %150 = arith.addf %149, %143 : vector<16x1xf32>
    %151 = vector.broadcast %150 : vector<16x1xf32> to vector<16x32xf32>
    %152 = arith.subf %141, %151 : vector<16x32xf32>
    %c0_40 = arith.constant 0 : index
    %c0_41 = arith.constant 0 : index
    %153 = vector.load %arg5[%c0_40, %c0_41] : memref<16x32xf32, #tpu.memory_space<vmem>>, vector<16x32xf32>
    tpu.vector_store %arg5[%c0_40, %c0_41], %152 {strides = array<i32>} : memref<16x32xf32, #tpu.memory_space<vmem>>, vector<16x32xf32>,
    return
  }
}

</mosaic_0001>

<bundles_post_ra>
// kernel: decoder_forward.1
= control target key start
LH: loop header
LB: loop body
LE: loop exit
PB: predicated region body
PF: predicated region fallthrough
CT: control target
= control target key end

     0   :  { %v1123_v0 = vmov 0   ;;  %v1124_v9 = vmov 0.0|0.0   ;;  %v24_v13 = vlaneseq  ;;  %vm42_vm0 = vcmask 261120   ;;  %s1127_s27 = smov 64   ;;  %s1128_s28 = smov 32   ;;  %s1338_s0 = inlined_call_operand.vmem [shape: s32[16,1], index: 0, kind: input, shape index: {}]   ;;  %s1339_s2 = inlined_call_operand.vmem [shape: f32[32,32], index: 2, kind: input, shape index: {}]   ;;  %s1340_s3 = inlined_call_operand.vmem [shape: f32[2,66,96], index: 3, kind: input, shape index: {}]   ;;  %s1341_s1 = inlined_call_operand.vmem [shape: f32[2,8,32], index: 1, kind: input, shape index: {}, may-alias: {1,6}]   ;;  %s1342_s6 = inlined_call_operand.vmem [shape: f32[2,8,32], index: 6, kind: output, shape index: {1}, may-alias: {1,6}]   ;;  %s1343_s4 = inlined_call_operand.vmem [shape: f32[33,32], index: 4, kind: input, shape index: {}]   ;;  %s1344_s5 = inlined_call_operand.vmem [shape: f32[16,32], index: 5, kind: output, shape index: {0}]  }
   0x1   :  { %1090 = vset.pattern.permute.xlu0 %v1123_v0  ;;  %v22_v1 = vld [vmem:[%s1338_s0] sm:$0xff]  ;;  %v39_v3 = vld [vmem:[%s1339_s2 + $0x8] sm:$0xff]  ;;  %v40_v4 = vld [vmem:[%s1339_s2 + $0x10] sm:$0xff]  ;;  %v1125_v18 = vmov 0.0   ;;  %vm1126_vm3 = vmmov 0   ;;  %s1129_s29 = smov 96  }
   0x2   :  { %v38_v2 = vld [vmem:[%s1339_s2] sm:$0xff]  ;;  %27 = vperm.xlu0 %1090, %v22_v1   ;;  %v41_v5 = vld [vmem:[%s1339_s2 + $0x18] sm:$0xff]  ;;  %v23_v6 = vld [vmem:[%s1338_s0 + $0x8] sm:$0xff]  ;;  %v25_v14 = vand.u32 127, %v24_v13  ;;  %v1220_v30 = vshrl.u32 %v24_v13, 7 }
   0x3   :  { %v1027_v7 = vpack.c.bf16 %v39_v3, %v38_v2  ;;  %v1031_v8 = vpack.c.bf16 %v41_v5, %v40_v4  ;;  %v126_v10 = vld [vmem:[%s1340_s3] sm:$0xff]  ;;  %v127_v11 = vld [vmem:[%s1340_s3 + $0x8] sm:$0xff]  ;;  %v132_v22 = vld [vmem:[%s1340_s3 + $0x30] sm:$0xff] }
   0x4   :  { %v1035_v12 = vpack.c.bf16 %v127_v11, %v126_v10  ;;  %v130_v16 = vld [vmem:[%s1340_s3 + $0x20] sm:$0xff]  ;;  %v131_v17 = vld [vmem:[%s1340_s3 + $0x28] sm:$0xff]  ;;  %v133_v23 = vld [vmem:[%s1340_s3 + $0x38] sm:$0xff]  ;;  %v137_v33 = vsub.s32 1, %v1220_v30  ;;  %v141_v41 = vsub.s32 0, %v1220_v30 }
   0x5   :  { %1028 = vmatprep.subr.bf16.mxu0 %v1027_v7  ;;  %v1044_v21 = vpack.c.bf16 %v131_v17, %v130_v16  ;;  %v1047_v25 = vpack.c.bf16 %v133_v23, %v132_v22  ;;  %v224_v26 = vld [vmem:[%s1341_s1] sm:$0xff]  ;;  %v128_v27 = vld [vmem:[%s1340_s3 + $0x10] sm:$0xff]  ;;  %v129_v28 = vld [vmem:[%s1340_s3 + $0x18] sm:$0xff] }
   0x6   :  { %30 = vperm.xlu0 %1090, %v23_v6   ;;  %1030 = vmatpush3.bf16.msra.mxu0 %v1027_v7  ;;  %v1039_v29 = vpack.c.bf16 %v129_v28, %v128_v27  ;;  %v134_v35 = vld [vmem:[%s1340_s3 + $0x40] sm:$0x3]  ;;  %v879_v13 = vld [vmem:[%s1340_s3 + $0x68] sm:$0xff] }
   0x7   :  { %1032 = vmatprep.subr.bf16.mxu0 %v1031_v8  ;;  %1036 = vmatprep.subr.bf16.mxu1 %v1035_v12  ;;  %v138_v37 = vrot.slane %v134_v35, %v137_v33  ;;  %v142_v42 = vrot.slane %v134_v35, %v141_v41  ;;  %v882_v17 = vld [vmem:[%s1340_s3 + $0x80] sm:$0xff]  ;;  %v883_v35 = vld [vmem:[%s1340_s3 + $0x88] sm:$0x3] }
   0x8   :  { %1038 = vmatpush3.bf16.msra.mxu1 %v1035_v12  ;;  %v878_v22 = vld [vmem:[%s1340_s3 + $0x60] sm:$0xff] }
   0x9   :  { %1040 = vmatprep.subr.bf16.mxu1 %v1039_v29 }
   0xa   :  { %1034 = vmatpush3.bf16.msra.mxu0 %v1031_v8 }
   0xb   :  { %1043 = vmatprep.subr.bf16.mxu0 %v1124_v9 }
   0xc   :  { %1042 = vmatpush3.bf16.msra.mxu1 %v1039_v29 }
   0xd   :  { %1049 = vmatprep.subr.bf16.mxu1 %v1124_v9 }
  0x81   :  { %v28_v15 = vpop.permute.xlu0 %27 }
  0x82   :  { %vm32_vm1 = vcmp.eq.s32.totalorder %v28_v15, %v25_v14  ;;  %v881_v15 = vld [vmem:[%s1340_s3 + $0x78] sm:$0xff] }
  0x83   :  { %v865_v19 = vsel %vm32_vm1, 1.0, %v1125_v18  ;;  %v1067_v23 = vpack.c.bf16 %v882_v17, %v881_v15 }
  0x84   :  { %947 = vmatprep.mubr.msk.f32.mxu0 %vm42_vm0, %v865_v19  ;;  %v875_v19 = vld [vmem:[%s1340_s3 + $0x48] sm:$0xff] }
  0x85   :  { %v31_v20 = vpop.permute.xlu0 %30 }
  0x86   :  { %vm33_vm2 = vcmp.eq.s32.totalorder %v31_v20, %v25_v14  ;;  %v880_v14 = vld [vmem:[%s1340_s3 + $0x70] sm:$0xff] }
  0x87   :  { %v866_v24 = vsel %vm33_vm2, 1.0, %v1125_v18  ;;  %v1064_v16 = vpack.c.bf16 %v880_v14, %v879_v13  ;;  %v876_v20 = vld [vmem:[%s1340_s3 + $0x50] sm:$0xff] }
  0x88   :  { %948 = vmatmul.mubr.msk.f32.vlgmr.msra.gmra.mrb[0].mxu0 %vm42_vm0, %v866_v24  ;;  %v1055_v24 = vpack.c.bf16 %v876_v20, %v875_v19 }
  0x89   :  { %1045 = vmatpush3.bf16.msra.mxu0 %v1044_v21  ;;  %969 = vmatprep.mubr.msk.f32.mxu0 %vm1126_vm3, %v1125_v18 }
  0x8a   :  { %1046 = vmatprep.subr.bf16.mxu0 %v1124_v9 }
  0x8d   :  { %1048 = vmatpush3.bf16.msra.mxu0 %v1047_v25 }
  0x8e   :  { %1056 = vmatprep.subr.bf16.mxu0 %v1055_v24 }
  0x90   :  { %970 = vmatmul.mubr.msk.f32.vlgmr.msra.gmra.mrb[2].mxu0 %vm42_vm0, %v224_v26 }
  0x91   :  { %1058 = vmatpush3.bf16.msra.mxu0 %v1055_v24 }
 0x15b   :  { %v949_v31 = vpop.f32.mrb[0].mxu0 }
 0x15c   :  { %v115_v32 = vpop.f32.mrb[1].mxu0  ;;  %v125_v36 = vmax.f32 %v949_v31, 0.0 }
 0x15d   :  { %v124_v34 = vmax.f32 %v115_v32, 0.0 }
 0x15f   :  { %958 = vmatprep.mubr.msk.f32.mxu1 %vm42_vm0, %v124_v34 }
 0x160   :  { %959 = vmatmul.mubr.msk.f32.vlgmr.msra.gmra.mrb[0].mxu1 %vm42_vm0, %v125_v36  ;;  %v448_v36 = vrot.slane %v883_v35, %v137_v33  ;;  %v452_v33 = vrot.slane %v883_v35, %v141_v41 }
 0x161   :  { %1051 = vmatpush3.bf16.msra.mxu1 %v1044_v21  ;;  %980 = vmatprep.mubr.msk.f32.mxu1 %vm1126_vm3, %v1125_v18  ;;  %v877_v21 = vld [vmem:[%s1340_s3 + $0x58] sm:$0xff] }
 0x162   :  { %1052 = vmatprep.subr.bf16.mxu1 %v1124_v9 }
 0x163   :  { %v294_v38 = vpop.f32.mrb[2].mxu0 }
 0x164   :  { %v971_v39 = vpop.f32.mrb[3].mxu0  ;;  %v305_v40 = vadd.f32 %v294_v38, %v138_v37 }
 0x165   :  { %1054 = vmatpush3.bf16.msra.mxu1 %v1047_v25  ;;  %v1059_v25 = vpack.c.bf16 %v878_v22, %v877_v21  ;;  %v892_v22 = vld [vmem:[%s1343_s4 + $0x20] ss:$0 sm:$0xff] }
 0x166   :  { %307 = vrot.lane.b32.xlu1 %v305_v40, %s1127_s27  ;;  %1063 = vmatprep.subr.bf16.mxu1 %v1124_v9 }
 0x167   :  { %1060 = vmatprep.subr.bf16.mxu0 %v1059_v25 }
 0x168   :  { %1062 = vmatpush3.bf16.msra.mxu0 %v1059_v25 }
 0x169   :  { %1069 = vmatprep.subr.bf16.mxu0 %v1124_v9 }
 0x1d8   :  { %v308_v51 = vpop.permute.xlu1 %307 }
 0x233   :  { %v960_v43 = vpop.f32.mrb[0].mxu1 }
 0x234   :  { %v221_v44 = vadd.f32 %v960_v43, %v142_v42  ;;  %v215_v45 = vpop.f32.mrb[1].mxu1 }
 0x235   :  { %v216_v46 = vadd.f32 %v215_v45, %v142_v42 }
 0x237   :  { %v298_v47 = vadd.f32 %v294_v38, %v216_v46 }
 0x239   :  { %v872_v48 = vmul.f32 -1.442695, %v298_v47 }
 0x23b   :  { %1091 = vpow2.f32 %v872_v48 }
 0x245   :  { %v1092_v49 = vpop.eup %1091 }
 0x246   :  { %v302_v50 = vadd.f32 1.0, %v1092_v49 }
 0x248   :  { %1093 = vrcp.f32 %v302_v50 }
 0x252   :  { %v1094_v52 = vpop.eup %1093 }
 0x253   :  { %v310_v53 = vmul.f32 %v1094_v52, %v308_v51  ;;  %v317_v58 = vsub.f32 1.0, %v1094_v52 }
 0x255   :  { %312 = vrot.lane.b32.xlu1 %v310_v53, %s1127_s27 }
 0x259   :  { %323 = vrot.lane.b32.xlu1 %v224_v26, %s1128_s28  ;;  %v886_v26 = vld [vmem:[%s1341_s1 + $0x8] sm:$0xff] }
 0x2c7   :  { %v313_v54 = vpop.permute.xlu1 %312 }
 0x2c8   :  { %v315_v55 = vadd.f32 %v313_v54, %v216_v46 }
 0x2ca   :  { %1095 = vtanh.f32 %v315_v55 }
 0x2cb   :  { %v324_v57 = vpop.permute.xlu1 %323 }
 0x2cc   :  { %v326_v60 = vmul.f32 %v1094_v52, %v324_v57 }
 0x2d4   :  { %v1096_v56 = vpop.eup %1095 }
 0x2d5   :  { %319 = vrot.lane.b32.xlu0 %v1096_v56, %s1129_s29 }
 0x347   :  { %v320_v59 = vpop.permute.xlu0 %319 }
 0x348   :  { %v322_v61 = vmul.f32 %v320_v59, %v317_v58 }
 0x34a   :  { %v327_v62 = vadd.f32 %v326_v60, %v322_v61 }
 0x34c   :  { %329 = vrot.lane.b32.xlu0 %v327_v62, %s1129_s29 }
 0x3be   :  { %v330_v63 = vpop.permute.xlu0 %329 }
 0x3bf   :  { %981 = vmatmul.mubr.msk.f32.vlgmr.msra.gmra.mrb[2].mxu1 %vm42_vm0, %v330_v63  ;;  %991 = vmatprep.mubr.msk.f32.mxu0 %vm42_vm0, %v330_v63 }
 0x3c0   :  { %1002 = vmatprep.mubr.msk.f32.mxu1 %vm1126_vm3, %v1125_v18  ;;  %1065 = vmatpush3.bf16.msra.mxu1 %v1064_v16 }
 0x3c1   :  { %1066 = vmatprep.subr.bf16.mxu1 %v1124_v9 }
 0x3c4   :  { %1068 = vmatpush3.bf16.msra.mxu1 %v1067_v23 }
 0x3c7   :  { %1003 = vmatmul.mubr.msk.f32.vlgmr.msra.gmra.mrb[4].mxu1 %vm42_vm0, %v886_v26 }
 0x492   :  { %v399_v0 = vpop.f32.mrb[2].mxu1 }
 0x493   :  { %v410_v1 = vadd.f32 %v399_v0, %v138_v37  ;;  %v982_v2 = vpop.f32.mrb[3].mxu1  ;;  %v403_v3 = vadd.f32 %v399_v0, %v221_v44 }
 0x495   :  { %412 = vrot.lane.b32.xlu1 %v410_v1, %s1127_s27  ;;  %v874_v4 = vmul.f32 -1.442695, %v403_v3 }
 0x497   :  { %1097 = vpow2.f32 %v874_v4 }
 0x49a   :  { %v601_v37 = vpop.f32.mrb[4].mxu1 }
 0x49b   :  { %v612_v38 = vadd.f32 %v601_v37, %v448_v36  ;;  %v1004_v39 = vpop.f32.mrb[5].mxu1 }
 0x4a1   :  { %v1098_v5 = vpop.eup %1097 }
 0x4a2   :  { %v407_v6 = vadd.f32 1.0, %v1098_v5 }
 0x4a4   :  { %1099 = vrcp.f32 %v407_v6 }
 0x4ae   :  { %v1100_v7 = vpop.eup %1099 }
 0x4af   :  { %v422_v28 = vsub.f32 1.0, %v1100_v7  ;;  %v428_v31 = vmul.f32 %v1100_v7, %v327_v62 }
 0x507   :  { %v413_v8 = vpop.permute.xlu1 %412 }
 0x508   :  { %v415_v10 = vmul.f32 %v1100_v7, %v413_v8  ;;  %v743_v7 = vld [vmem:[%s1343_s4] sm:$0xff]  ;;  %v744_v8 = vld [vmem:[%s1343_s4 + $0x8] sm:$0xff] }
 0x50a   :  { %417 = vrot.lane.b32.xlu0 %v415_v10, %s1127_s27  ;;  %v745_v10 = vld [vmem:[%s1343_s4 + $0x10] sm:$0xff] }
 0x57c   :  { %v418_v11 = vpop.permute.xlu0 %417 }
 0x57d   :  { %v420_v12 = vadd.f32 %v418_v11, %v221_v44  ;;  %v1075_v11 = vpack.c.bf16 %v744_v8, %v743_v7 }
 0x57f   :  { %1101 = vtanh.f32 %v420_v12  ;;  %v746_v12 = vld [vmem:[%s1343_s4 + $0x18] sm:$0xff]  ;;  %1076 = vmatprep.subr.bf16.mxu1 %v1075_v11 }
 0x580   :  { %v1079_v13 = vpack.c.bf16 %v746_v12, %v745_v10  ;;  %1078 = vmatpush3.bf16.msra.mxu1 %v1075_v11 }
 0x582   :  { %1080 = vmatprep.subr.bf16.mxu1 %v1079_v13 }
 0x584   :  { %1082 = vmatpush3.bf16.msra.mxu1 %v1079_v13 }
 0x589   :  { %v1102_v27 = vpop.eup %1101 }
 0x58a   :  { %424 = vrot.lane.b32.xlu1 %v1102_v27, %s1129_s29 }
 0x58e   :  { %614 = vrot.lane.b32.xlu1 %v612_v38, %s1127_s27 }
 0x5fc   :  { %v425_v29 = vpop.permute.xlu1 %424 }
 0x5fd   :  { %v427_v32 = vmul.f32 %v425_v29, %v422_v28 }
 0x5ff   :  { %v429_v34 = vadd.f32 %v428_v31, %v427_v32 }
 0x600   :  { %v615_v50 = vpop.permute.xlu1 %614 }
 0x601   :  { %431 = vrot.lane.b32.xlu0 %v429_v34, %s1129_s29 }
 0x673   :  { %v432_v40 = vpop.permute.xlu0 %431 }
 0x674   :  { %434 = vst.msk [vmem:[%s1342_s6] sm:$0xff] %vm42_vm0, %v432_v40  ;;  %992 = vmatmul.mubr.msk.f32.vlgmr.msra.gmra.mrb[4].mxu0 %vm42_vm0, %v432_v40 }
 0x675   :  { %1071 = vmatpush3.bf16.msra.mxu0 %v1064_v16  ;;  %1013 = vmatprep.mubr.msk.f32.mxu0 %vm1126_vm3, %v1125_v18 }
 0x676   :  { %1072 = vmatprep.subr.bf16.mxu0 %v1124_v9 }
 0x679   :  { %1074 = vmatpush3.bf16.msra.mxu0 %v1067_v23 }
 0x747   :  { %v993_v42 = vpop.f32.mrb[4].mxu0 }
 0x748   :  { %v527_v43 = vadd.f32 %v993_v42, %v452_v33  ;;  %v521_v44 = vpop.f32.mrb[5].mxu0 }
 0x749   :  { %v522_v45 = vadd.f32 %v521_v44, %v452_v33 }
 0x74b   :  { %v605_v46 = vadd.f32 %v601_v37, %v522_v45 }
 0x74d   :  { %v888_v47 = vmul.f32 -1.442695, %v605_v46 }
 0x74f   :  { %1103 = vpow2.f32 %v888_v47 }
 0x759   :  { %v1104_v48 = vpop.eup %1103 }
 0x75a   :  { %v609_v49 = vadd.f32 1.0, %v1104_v48 }
 0x75c   :  { %1105 = vrcp.f32 %v609_v49 }
 0x766   :  { %v1106_v51 = vpop.eup %1105 }
 0x767   :  { %v617_v52 = vmul.f32 %v1106_v51, %v615_v50  ;;  %v624_v53 = vsub.f32 1.0, %v1106_v51 }
 0x769   :  { %619 = vrot.lane.b32.xlu0 %v617_v52, %s1127_s27 }
 0x76d   :  { %630 = vrot.lane.b32.xlu0 %v886_v26, %s1128_s28 }
 0x7db   :  { %v620_v9 = vpop.permute.xlu0 %619 }
 0x7dc   :  { %v622_v18 = vadd.f32 %v620_v9, %v522_v45 }
 0x7de   :  { %1107 = vtanh.f32 %v622_v18 }
 0x7df   :  { %v631_v41 = vpop.permute.xlu0 %630 }
 0x7e0   :  { %v633_v55 = vmul.f32 %v1106_v51, %v631_v41 }
 0x7e8   :  { %v1108_v30 = vpop.eup %1107 }
 0x7e9   :  { %626 = vrot.lane.b32.xlu1 %v1108_v30, %s1129_s29 }
 0x85b   :  { %v627_v54 = vpop.permute.xlu1 %626 }
 0x85c   :  { %v629_v56 = vmul.f32 %v627_v54, %v624_v53 }
 0x85e   :  { %v634_v57 = vadd.f32 %v633_v55, %v629_v56 }
 0x860   :  { %636 = vrot.lane.b32.xlu1 %v634_v57, %s1129_s29 }
 0x8d2   :  { %v637_v58 = vpop.permute.xlu1 %636 }
 0x8d3   :  { %1014 = vmatmul.mubr.msk.f32.vlgmr.msra.gmra.mrb[6].mxu0 %vm42_vm0, %v637_v58  ;;  %1024 = vmatprep.mubr.msk.f32.mxu1 %vm42_vm0, %v637_v58 }
 0x9a6   :  { %v706_v59 = vpop.f32.mrb[6].mxu0 }
 0x9a7   :  { %v717_v60 = vadd.f32 %v706_v59, %v448_v36  ;;  %v1015_v61 = vpop.f32.mrb[7].mxu0  ;;  %v710_v62 = vadd.f32 %v706_v59, %v527_v43 }
 0x9a9   :  { %719 = vrot.lane.b32.xlu0 %v717_v60, %s1127_s27  ;;  %v890_v63 = vmul.f32 -1.442695, %v710_v62 }
 0x9ab   :  { %1109 = vpow2.f32 %v890_v63 }
 0x9b5   :  { %v1110_v0 = vpop.eup %1109 }
 0x9b6   :  { %v714_v1 = vadd.f32 1.0, %v1110_v0 }
 0x9b8   :  { %1111 = vrcp.f32 %v714_v1 }
 0x9c2   :  { %v1112_v2 = vpop.eup %1111 }
 0x9c3   :  { %v729_v15 = vsub.f32 1.0, %v1112_v2  ;;  %v735_v17 = vmul.f32 %v1112_v2, %v634_v57 }
 0xa1b   :  { %v720_v3 = vpop.permute.xlu0 %719 }
 0xa1c   :  { %v722_v4 = vmul.f32 %v1112_v2, %v720_v3 }
 0xa1e   :  { %724 = vrot.lane.b32.xlu1 %v722_v4, %s1127_s27 }
 0xa90   :  { %v725_v5 = vpop.permute.xlu1 %724 }
 0xa91   :  { %v727_v6 = vadd.f32 %v725_v5, %v527_v43 }
 0xa93   :  { %1113 = vtanh.f32 %v727_v6 }
 0xa9d   :  { %v1114_v14 = vpop.eup %1113 }
 0xa9e   :  { %731 = vrot.lane.b32.xlu0 %v1114_v14, %s1129_s29 }
 0xb10   :  { %v732_v16 = vpop.permute.xlu0 %731 }
 0xb11   :  { %v734_v19 = vmul.f32 %v732_v16, %v729_v15 }
 0xb13   :  { %v736_v20 = vadd.f32 %v735_v17, %v734_v19 }
 0xb15   :  { %738 = vrot.lane.b32.xlu1 %v736_v20, %s1129_s29 }
 0xb87   :  { %v739_v21 = vpop.permute.xlu1 %738 }
 0xb88   :  { %891 = vst.msk [vmem:[%s1342_s6 + $0x8] sm:$0xff] %vm42_vm0, %v739_v21  ;;  %1025 = vmatmul.mubr.msk.f32.vlgmr.msra.gmra.mrb[6].mxu1 %vm42_vm0, %v739_v21 }
 0xc5b   :  { %v1026_v23 = vpop.f32.mrb[6].mxu1 }
 0xc5c   :  { %v826_v24 = vadd.f32 %v1026_v23, %v892_v22  ;;  %v820_v25 = vpop.f32.mrb[7].mxu1 }
 0xc5d   :  { %v821_v26 = vadd.f32 %v892_v22, %v820_v25 }
 0xc5e   :  { %v832_v27 = vsel %vm42_vm0, %v826_v24, -inf }
 0xc5f   :  { %833 = vmax.xlane.f32.xlu1 %v832_v27  ;;  %v829_v28 = vsel %vm42_vm0, %v821_v26, -inf }
 0xc60   :  { %830 = vmax.xlane.f32.xlu0 %v829_v28 }
 0xcec   :  { %v834_v29 = vpop.xlane.xlu1 %833 }
 0xced   :  { %v836_v31 = vsub.f32 %v826_v24, %v834_v29  ;;  %v831_v32 = vpop.xlane.xlu0 %830 }
 0xcee   :  { %v835_v34 = vsub.f32 %v821_v26, %v831_v32 }
 0xcef   :  { %v839_v35 = vmul.f32 1.442695, %v836_v31 }
 0xcf0   :  { %v837_v36 = vmul.f32 1.442695, %v835_v34 }
 0xcf2   :  { %1115 = vpow2.f32 %v837_v36 }
 0xcf3   :  { %1117 = vpow2.f32 %v839_v35 }
 0xcfc   :  { %v1116_v37 = vpop.eup %1115 }
 0xcfd   :  { %v841_v38 = vsel %vm42_vm0, %v1116_v37, 0.0  ;;  %v1118_v39 = vpop.eup %1117 }
 0xcfe   :  { %842 = vadd.xlane.f32.xlu0 %v841_v38  ;;  %v844_v40 = vsel %vm42_vm0, %v1118_v39, 0.0 }
 0xd02   :  { %845 = vadd.xlane.f32.xlu0 %v844_v40 }
 0xd8b   :  { %v843_v33 = vpop.xlane.xlu0 %842 }
 0xd8c   :  { %1119 = vlog2.f32 %v843_v33 }
 0xd8f   :  { %v846_v42 = vpop.xlane.xlu0 %845 }
 0xd90   :  { %1121 = vlog2.f32 %v846_v42 }
 0xd96   :  { %v1120_v43 = vpop.eup %1119 }
 0xd97   :  { %v848_v44 = vmul.f32 0.6931472, %v1120_v43 }
 0xd99   :  { %v851_v45 = vadd.f32 %v848_v44, %v831_v32 }
 0xd9a   :  { %v1122_v46 = vpop.eup %1121 }
 0xd9b   :  { %v853_v47 = vsub.f32 %v821_v26, %v851_v45  ;;  %v850_v48 = vmul.f32 0.6931472, %v1122_v46 }
 0xd9d   :  { %855 = vst.msk [vmem:[%s1344_s5] sm:$0xff] %vm42_vm0, %v853_v47  ;;  %v852_v49 = vadd.f32 %v850_v48, %v834_v29 }
 0xd9f   :  { %v854_v50 = vsub.f32 %v826_v24, %v852_v49 }
 0xda1   :  { %856 = vst.msk [vmem:[%s1344_s5 + $0x8] sm:$0xff] %vm42_vm0, %v854_v50 }

</bundles_post_ra>
